<compile_context>
chip_gen: v6e
topology: v6e:2x2x1
jax: 0.10.0
libtpu: 0.0.40
codegen_flags: <defaults>
</compile_context>

<pallas_src>
import math
from functools import partial

import jax
import jax.numpy as jnp
from jax import lax
from jax.experimental import pallas as pl
from jax.experimental.pallas import tpu as pltpu


def _round_up(a, b):
    return ((a + b - 1) // b) * b


def _concat_linear_kernel(x_ref, w_ref, b_ref, o_ref, acc_ref):
    """General path: grid = (M tiles, N tiles, K tiles); axis 2 is the reduction."""
    k = pl.program_id(2)

    @pl.when(k == 0)
    def _():
        acc_ref[...] = jnp.zeros_like(acc_ref)

    # x_ref: (tm, tk), w_ref: (tn, tk) in PyTorch (out, in) layout.
    # Contract the last dims of both -> (tm, tn); the MXU handles the
    # transposed RHS natively, so no wrapper-side weight.T is needed.
    acc_ref[...] += lax.dot_general(
        x_ref[...],
        w_ref[...],
        dimension_numbers=(((1,), (1,)), ((), ())),
        preferred_element_type=jnp.float32,
    )

    @pl.when(k == pl.num_programs(2) - 1)
    def _():
        y = acc_ref[...] + b_ref[...].astype(jnp.float32)  # (tm,tn) + (1,tn)
        o_ref[...] = y.astype(o_ref.dtype)


def _concat_linear_kernel_1k(x_ref, w_ref, b_ref, o_ref):
    """Fast path: the whole K reduction fits in one tile -> no accumulator."""
    y = lax.dot_general(
        x_ref[...],
        w_ref[...],
        dimension_numbers=(((1,), (1,)), ((), ())),
        preferred_element_type=jnp.float32,
    )
    o_ref[...] = (y + b_ref[...].astype(jnp.float32)).astype(o_ref.dtype)


@partial(jax.jit, static_argnames=("tm", "tn", "tk", "vmem_limit_bytes"))
def fused_linear(x, weight, bias, *, tm=256, tn=256, tk=512,
                 vmem_limit_bytes=None):
    """y = x @ weight.T + bias  (weight in PyTorch (N, K) layout).

    x:      (..., K)
    weight: (N, K)
    bias:   (N,)
    returns (..., N)
    """
    orig_shape = x.shape
    K = orig_shape[-1]
    N, Kw = weight.shape
    assert Kw == K, (Kw, K)

    x2d = x.reshape(-1, K)
    M = x2d.shape[0]

    # Effective tiles: capped, hardware-aligned (sublane 8 / lane 128).
    tm_eff = min(tm, _round_up(M, 8))
    tn_eff = min(tn, _round_up(N, 128))
    tk_eff = min(tk, _round_up(K, 128))

    Mp = _round_up(M, tm_eff)
    Np = _round_up(N, tn_eff)
    Kp = _round_up(K, tk_eff)

    # Pad once in the wrapper (zero K/N padding is exact for a matmul; padded
    # rows/cols are sliced off below).  Keeps output stores lane-dense.
    if (Mp, Kp) != (M, K):
        x2d = jnp.pad(x2d, ((0, Mp - M), (0, Kp - K)))
    w_p = weight
    if (Np, Kp) != (N, K):
        w_p = jnp.pad(weight, ((0, Np - N), (0, Kp - K)))
    b2d = bias.reshape(1, N)
    if Np != N:
        b2d = jnp.pad(b2d, ((0, 0), (0, Np - N)))

    grid_m = Mp // tm_eff
    grid_n = Np // tn_eff
    grid_k = Kp // tk_eff

    out_dtype = x.dtype

    if vmem_limit_bytes is None:
        # Double-buffered input/output tiles + f32 accumulator, with headroom.
        est = (
            2 * (tm_eff * tk_eff * x2d.dtype.itemsize
                 + tn_eff * tk_eff * w_p.dtype.itemsize
                 + tn_eff * b2d.dtype.itemsize
                 + tm_eff * tn_eff * jnp.dtype(out_dtype).itemsize)
            + tm_eff * tn_eff * 4
        )
        # Cap at 64 MiB so the same budget is valid on v7x (64 MiB VMEM / TC).
        vmem_limit_bytes = int(min(max(2 * est, 32 << 20), 64 << 20))

    if grid_k == 1:
        out2d = pl.pallas_call(
            _concat_linear_kernel_1k,
            out_shape=jax.ShapeDtypeStruct((Mp, Np), out_dtype),
            grid_spec=pltpu.PrefetchScalarGridSpec(
                num_scalar_prefetch=0,
                grid=(grid_m, grid_n),
                in_specs=[
                    pl.BlockSpec((tm_eff, tk_eff), lambda i, j: (i, 0)),
                    pl.BlockSpec((tn_eff, tk_eff), lambda i, j: (j, 0)),
                    pl.BlockSpec((1, tn_eff), lambda i, j: (0, j)),
                ],
                out_specs=pl.BlockSpec((tm_eff, tn_eff), lambda i, j: (i, j)),
            ),
            compiler_params=pltpu.CompilerParams(
                dimension_semantics=("parallel", "parallel"),
                vmem_limit_bytes=vmem_limit_bytes,
            ),
        )(x2d, w_p, b2d)
    else:
        out2d = pl.pallas_call(
            _concat_linear_kernel,
            out_shape=jax.ShapeDtypeStruct((Mp, Np), out_dtype),
            grid_spec=pltpu.PrefetchScalarGridSpec(
                num_scalar_prefetch=0,
                grid=(grid_m, grid_n, grid_k),
                in_specs=[
                    pl.BlockSpec((tm_eff, tk_eff), lambda i, j, k: (i, k)),
                    pl.BlockSpec((tn_eff, tk_eff), lambda i, j, k: (j, k)),
                    # bias block index is invariant over k -> DMA'd once per (i,j)
                    pl.BlockSpec((1, tn_eff), lambda i, j, k: (0, j)),
                ],
                out_specs=pl.BlockSpec((tm_eff, tn_eff), lambda i, j, k: (i, j)),
                scratch_shapes=[pltpu.VMEM((tm_eff, tn_eff), jnp.float32)],
            ),
            compiler_params=pltpu.CompilerParams(
                dimension_semantics=("parallel", "parallel", "arbitrary"),
                vmem_limit_bytes=vmem_limit_bytes,
            ),
        )(x2d, w_p, b2d)

    out2d = out2d[:M, :N]
    return out2d.reshape(*orig_shape[:-1], N)


class ConcatLinear:
    """JAX/Pallas equivalent of _IPEXConcatLinearRef.

    Weights/biases of the individual nn.Linear layers are concatenated ONCE at
    construction time (init-time cost, not per call); __call__ runs a single
    fused GEMM+bias kernel and slices the result back into a tuple.
    """

    def __init__(self, weights, biases=None, *, tm=256, tn=256, tk=512):
        weights = [jnp.asarray(w) for w in weights]
        self.num_concat = len(weights)
        self.out_features = [int(w.shape[0]) for w in weights]
        self.in_features = int(weights[0].shape[1])
        if biases is None:
            biases = [None] * self.num_concat
        biases = [
            jnp.zeros((w.shape[0],), w.dtype) if b is None else jnp.asarray(b)
            for w, b in zip(weights, biases)
        ]
        # Native PyTorch (out_features, in_features) layout -- no transpose.
        self.w_cat = jnp.concatenate(weights, axis=0)
        self.b_cat = jnp.concatenate(biases, axis=0)
        self._tiles = dict(tm=tm, tn=tn, tk=tk)

    def __call__(self, x):
        y = fused_linear(x, self.w_cat, self.b_cat, **self._tiles)
        outs = []
        off = 0
        for n in self.out_features:
            outs.append(y[..., off:off + n])
            off += n
        return tuple(outs)


def _reference(x, weights, biases):
    return tuple(
        jnp.einsum("...k,nk->...n", x, w) + b for w, b in zip(weights, biases)
    )


def _make_params(key, in_features, out_features_list, dtype=jnp.float32):
    weights, biases = [], []
    bound = 1.0 / math.sqrt(in_features)
    for n in out_features_list:
        key, kw, kb = jax.random.split(key, 3)
        weights.append(
            jax.random.uniform(kw, (n, in_features), minval=-bound,
                               maxval=bound, dtype=dtype)
        )
        biases.append(
            jax.random.uniform(kb, (n,), minval=-bound, maxval=bound,
                               dtype=dtype)
        )
    return key, weights, biases


if __name__ == "__main__":
    key = jax.random.PRNGKey(0)

    # --- Test 1: small shapes, non-128 out_features, single-K fast path -----
    batch, seq, in_features = 2, 8, 32
    out_features = [64, 32, 96]  # e.g. differently-sized q/k/v projections

    key, kx = jax.random.split(key)
    x = jax.random.normal(kx, (batch, seq, in_features), dtype=jnp.float32)
    key, weights, biases = _make_params(key, in_features, out_features)

    mod = ConcatLinear(weights, biases)
    outs = jax.block_until_ready(mod(x))
    refs = _reference(x, weights, biases)

    assert isinstance(outs, tuple) and len(outs) == len(out_features)
    for o, r, n in zip(outs, refs, out_features):
        assert o.shape == (batch, seq, n), o.shape
        assert jnp.allclose(o, r, atol=2e-4, rtol=2e-4), (
            float(jnp.max(jnp.abs(o - r)))
        )

    # --- Test 2: force the tiled K-reduction (accumulator) path -------------
    in_features2 = 256
    out_features2 = [128, 128]
    key, kx2 = jax.random.split(key)
    x2 = jax.random.normal(kx2, (batch, seq, in_features2), dtype=jnp.float32)
    key, weights2, biases2 = _make_params(key, in_features2, out_features2)

    mod2 = ConcatLinear(weights2, biases2, tm=8, tn=128, tk=128)  # grid (2,2,2)
    outs2 = jax.block_until_ready(mod2(x2))
    refs2 = _reference(x2, weights2, biases2)
    for o, r, n in zip(outs2, refs2, out_features2):
        assert o.shape == (batch, seq, n), o.shape
        assert jnp.allclose(o, r, atol=2e-4, rtol=2e-4), (
            float(jnp.max(jnp.abs(o - r)))
        )

    print("KERNEL_OK")
</pallas_src>

<mosaic_0001>
module attributes {stable_mosaic.version = 11 : i64} {
  func.func @_concat_linear_kernel_1k(%arg0: i32, %arg1: i32, %arg2: memref<16x128xf32, #tpu.memory_space<vmem>>, %arg3: memref<256x128xf32, #tpu.memory_space<vmem>>, %arg4: memref<1x256xf32, #tpu.memory_space<vmem>>, %arg5: memref<16x256xf32, #tpu.memory_space<vmem>>) attributes {dimension_semantics = [#tpu.dimension_semantics<parallel>, #tpu.dimension_semantics<parallel>], iteration_bounds = array<i64: 1, 1>, scalar_prefetch = 0 : i64, scratch_operands = 0 : i64, tpu.core_type = #tpu.core_type<tc>, window_params = [{transform_indices = @transform_0, window_bounds = array<i64: 16, 128>}, {transform_indices = @transform_1, window_bounds = array<i64: 256, 128>}, {transform_indices = @transform_2, window_bounds = array<i64: 1, 256>}, {transform_indices = @transform_3, window_bounds = array<i64: 16, 256>}]} {
    %c0 = arith.constant 0 : index
    %c0_0 = arith.constant 0 : index
    %0 = vector.load %arg2[%c0, %c0_0] : memref<16x128xf32, #tpu.memory_space<vmem>>, vector<16x128xf32>
    %c0_1 = arith.constant 0 : index
    %c0_2 = arith.constant 0 : index
    %1 = vector.load %arg3[%c0_1, %c0_2] : memref<256x128xf32, #tpu.memory_space<vmem>>, vector<256x128xf32>
    %cst = arith.constant dense<0.000000e+00> : vector<16x256xf32>
    %2 = tpu.matmul %0, %1, %cst {dimension_numbers = #tpu.dot_dimension_numbers<[1], [1], [0], [0], [0, 0, 1, 0], [], []>} : vector<16x128xf32>, vector<256x128xf32>, vector<16x256xf32> -> vector<16x256xf32>
    %c0_3 = arith.constant 0 : index
    %c0_4 = arith.constant 0 : index
    %3 = vector.load %arg4[%c0_3, %c0_4] : memref<1x256xf32, #tpu.memory_space<vmem>>, vector<1x256xf32>
    %4 = vector.broadcast %3 : vector<1x256xf32> to vector<16x256xf32>
    %5 = arith.addf %2, %4 : vector<16x256xf32>
    %c0_5 = arith.constant 0 : index
    %c0_6 = arith.constant 0 : index
    %6 = vector.load %arg5[%c0_5, %c0_6] : memref<16x256xf32, #tpu.memory_space<vmem>>, vector<16x256xf32>
    tpu.vector_store %arg5[%c0_5, %c0_6], %5 {strides = array<i32>} : memref<16x256xf32, #tpu.memory_space<vmem>>, vector<16x256xf32>,
    return
  }
  func.func @transform_0(%arg0: i32, %arg1: i32) -> (i32, i32) {
    %c0_i32 = arith.constant 0 : i32
    %c0_i32_0 = arith.constant 0 : i32
    return %arg0, %c0_i32 : i32, i32
  }
  func.func @transform_1(%arg0: i32, %arg1: i32) -> (i32, i32) {
    %c0_i32 = arith.constant 0 : i32
    %c0_i32_0 = arith.constant 0 : i32
    return %arg1, %c0_i32 : i32, i32
  }
  func.func @transform_2(%arg0: i32, %arg1: i32) -> (i32, i32) {
    %c0_i32 = arith.constant 0 : i32
    %c0_i32_0 = arith.constant 0 : i32
    return %c0_i32, %arg1 : i32, i32
  }
  func.func @transform_3(%arg0: i32, %arg1: i32) -> (i32, i32) {
    %c0_i32 = arith.constant 0 : i32
    return %arg0, %arg1 : i32, i32
  }
}

</mosaic_0001>

<bundles_post_ra>
// kernel: fused_linear.1
= control target key start
LH: loop header
LB: loop body
LE: loop exit
PB: predicated region body
PF: predicated region fallthrough
CT: control target
= control target key end

     0   :  { %v50_v34 = vlaneseq  ;;  %s358_s1 = inlined_call_operand.vmem [shape: f32[256,128], index: 1, kind: input, shape index: {}]   ;;  %s359_s0 = inlined_call_operand.vmem [shape: f32[16,128], index: 0, kind: input, shape index: {}]   ;;  %s360_s2 = inlined_call_operand.vmem [shape: f32[1,256], index: 2, kind: input, shape index: {}]   ;;  %s361_s3 = inlined_call_operand.vmem [shape: f32[16,256], index: 3, kind: output, shape index: {}]  }
   0x1   :  { %v47_v0 = vld [vmem:[%s358_s1 + $0xf8] sm:$0xff]  ;;  %v46_v2 = vld [vmem:[%s358_s1 + $0xf0] sm:$0xff]  ;;  %v45_v4 = vld [vmem:[%s358_s1 + $0xe8] sm:$0xff] }
   0x2   :  { %v31_v1 = vld [vmem:[%s358_s1 + $0x78] sm:$0xff]  ;;  %145 = vmatprep.subr.mxu0 %v47_v0  ;;  %181 = vmatprep.subr.mxu1 %v47_v0  ;;  %v30_v3 = vld [vmem:[%s358_s1 + $0x70] sm:$0xff]  ;;  %v29_v5 = vld [vmem:[%s358_s1 + $0x68] sm:$0xff]  ;;  %v51_v35 = vshrl.u32 %v50_v34, 7 }
   0x3   :  { %146 = vmatpush3.xpose.msra.mxu0 %v31_v1  ;;  %197 = vmatpush3.xpose.msra.mxu1 %v31_v1  ;;  %v44_v6 = vld [vmem:[%s358_s1 + $0xe0] sm:$0xff]  ;;  %v265_v9 = vld [vmem:[%s359_s0 + $0x8] sm:$0xff]  ;;  %v43_v10 = vld [vmem:[%s358_s1 + $0xd8] sm:$0xff] }
   0x4   :  { %147 = vmatprep.subr.mxu0 %v46_v2  ;;  %182 = vmatprep.subr.mxu1 %v46_v2  ;;  %v257_v7 = vld [vmem:[%s359_s0] sm:$0xff]  ;;  %v27_v11 = vld [vmem:[%s358_s1 + $0x58] sm:$0xff]  ;;  %v42_v12 = vld [vmem:[%s358_s1 + $0xd0] sm:$0xff]  ;;  %v52_v36 = vsub.s32 0, %v51_v35  ;;  %v56_v38 = vsub.s32 1, %v51_v35 }
   0x5   :  { %v28_v8 = vld [vmem:[%s358_s1 + $0x60] sm:$0xff]  ;;  %177 = vmatprep.mubr.f32.mxu0 %v257_v7  ;;  %179 = vmatprep.mubr.f32.mxu1 %v265_v9  ;;  %v26_v13 = vld [vmem:[%s358_s1 + $0x50] sm:$0xff]  ;;  %v41_v14 = vld [vmem:[%s358_s1 + $0xc8] sm:$0xff] }
   0x6   :  { %v25_v15 = vld [vmem:[%s358_s1 + $0x48] sm:$0xff]  ;;  %v40_v16 = vld [vmem:[%s358_s1 + $0xc0] sm:$0xff]  ;;  %v39_v18 = vld [vmem:[%s358_s1 + $0xb8] sm:$0xff] }
   0x7   :  { %148 = vmatpush3.xpose.msra.mxu0 %v30_v3  ;;  %198 = vmatpush3.xpose.msra.mxu1 %v30_v3  ;;  %v24_v17 = vld [vmem:[%s358_s1 + $0x40] sm:$0xff]  ;;  %v23_v19 = vld [vmem:[%s358_s1 + $0x38] sm:$0xff]  ;;  %v38_v20 = vld [vmem:[%s358_s1 + $0xb0] sm:$0xff] }
   0x8   :  { %149 = vmatprep.subr.mxu0 %v45_v4  ;;  %183 = vmatprep.subr.mxu1 %v45_v4  ;;  %v22_v21 = vld [vmem:[%s358_s1 + $0x30] sm:$0xff]  ;;  %v37_v22 = vld [vmem:[%s358_s1 + $0xa8] sm:$0xff]  ;;  %v36_v24 = vld [vmem:[%s358_s1 + $0xa0] sm:$0xff] }
   0x9   :  { %v21_v23 = vld [vmem:[%s358_s1 + $0x28] sm:$0xff]  ;;  %v20_v25 = vld [vmem:[%s358_s1 + $0x20] sm:$0xff]  ;;  %v35_v26 = vld [vmem:[%s358_s1 + $0x98] sm:$0xff] }
   0xa   :  { %v19_v27 = vld [vmem:[%s358_s1 + $0x18] sm:$0xff]  ;;  %v34_v28 = vld [vmem:[%s358_s1 + $0x90] sm:$0xff]  ;;  %v33_v30 = vld [vmem:[%s358_s1 + $0x88] sm:$0xff] }
   0xb   :  { %150 = vmatpush3.xpose.msra.mxu0 %v29_v5  ;;  %199 = vmatpush3.xpose.msra.mxu1 %v29_v5  ;;  %v18_v29 = vld [vmem:[%s358_s1 + $0x10] sm:$0xff]  ;;  %v17_v31 = vld [vmem:[%s358_s1 + $0x8] sm:$0xff]  ;;  %v32_v32 = vld [vmem:[%s358_s1 + $0x80] sm:$0xff] }
   0xc   :  { %151 = vmatprep.subr.mxu0 %v44_v6  ;;  %184 = vmatprep.subr.mxu1 %v44_v6  ;;  %v16_v33 = vld [vmem:[%s358_s1] sm:$0xff] }
   0xd   :  { %v48_v37 = vld [vmem:[%s360_s2] sm:$0x3] }
   0xe   :  { %v53_v39 = vrot.slane %v48_v37, %v52_v36  ;;  %v57_v40 = vrot.slane %v48_v37, %v56_v38 }
   0xf   :  { %152 = vmatpush3.xpose.msra.mxu0 %v28_v8  ;;  %200 = vmatpush3.xpose.msra.mxu1 %v28_v8 }
  0x10   :  { %153 = vmatprep.subr.mxu0 %v43_v10  ;;  %185 = vmatprep.subr.mxu1 %v43_v10 }
  0x13   :  { %154 = vmatpush3.xpose.msra.mxu0 %v27_v11  ;;  %201 = vmatpush3.xpose.msra.mxu1 %v27_v11 }
  0x14   :  { %155 = vmatprep.subr.mxu0 %v42_v12  ;;  %186 = vmatprep.subr.mxu1 %v42_v12 }
  0x17   :  { %156 = vmatpush3.xpose.msra.mxu0 %v26_v13  ;;  %202 = vmatpush3.xpose.msra.mxu1 %v26_v13 }
  0x18   :  { %157 = vmatprep.subr.mxu0 %v41_v14  ;;  %187 = vmatprep.subr.mxu1 %v41_v14 }
  0x1b   :  { %158 = vmatpush3.xpose.msra.mxu0 %v25_v15  ;;  %203 = vmatpush3.xpose.msra.mxu1 %v25_v15 }
  0x1c   :  { %159 = vmatprep.subr.mxu0 %v40_v16  ;;  %188 = vmatprep.subr.mxu1 %v40_v16 }
  0x1f   :  { %160 = vmatpush3.xpose.msra.mxu0 %v24_v17  ;;  %204 = vmatpush3.xpose.msra.mxu1 %v24_v17 }
  0x20   :  { %161 = vmatprep.subr.mxu0 %v39_v18  ;;  %189 = vmatprep.subr.mxu1 %v39_v18 }
  0x23   :  { %162 = vmatpush3.xpose.msra.mxu0 %v23_v19  ;;  %205 = vmatpush3.xpose.msra.mxu1 %v23_v19 }
  0x24   :  { %163 = vmatprep.subr.mxu0 %v38_v20  ;;  %190 = vmatprep.subr.mxu1 %v38_v20 }
  0x27   :  { %164 = vmatpush3.xpose.msra.mxu0 %v22_v21  ;;  %206 = vmatpush3.xpose.msra.mxu1 %v22_v21 }
  0x28   :  { %165 = vmatprep.subr.mxu0 %v37_v22  ;;  %191 = vmatprep.subr.mxu1 %v37_v22 }
  0x2b   :  { %166 = vmatpush3.xpose.msra.mxu0 %v21_v23  ;;  %207 = vmatpush3.xpose.msra.mxu1 %v21_v23 }
  0x2c   :  { %167 = vmatprep.subr.mxu0 %v36_v24  ;;  %192 = vmatprep.subr.mxu1 %v36_v24 }
  0x2f   :  { %168 = vmatpush3.xpose.msra.mxu0 %v20_v25  ;;  %208 = vmatpush3.xpose.msra.mxu1 %v20_v25 }
  0x30   :  { %169 = vmatprep.subr.mxu0 %v35_v26  ;;  %193 = vmatprep.subr.mxu1 %v35_v26 }
  0x33   :  { %170 = vmatpush3.xpose.msra.mxu0 %v19_v27  ;;  %209 = vmatpush3.xpose.msra.mxu1 %v19_v27 }
  0x34   :  { %171 = vmatprep.subr.mxu0 %v34_v28  ;;  %194 = vmatprep.subr.mxu1 %v34_v28 }
  0x37   :  { %172 = vmatpush3.xpose.msra.mxu0 %v18_v29  ;;  %210 = vmatpush3.xpose.msra.mxu1 %v18_v29 }
  0x38   :  { %173 = vmatprep.subr.mxu0 %v33_v30  ;;  %195 = vmatprep.subr.mxu1 %v33_v30 }
  0x3b   :  { %174 = vmatpush3.xpose.msra.mxu0 %v17_v31  ;;  %211 = vmatpush3.xpose.msra.mxu1 %v17_v31 }
  0x3c   :  { %175 = vmatprep.subr.mxu0 %v32_v32  ;;  %196 = vmatprep.subr.mxu1 %v32_v32 }
  0x3f   :  { %176 = vmatpush3.xpose.msra.mxu0 %v16_v33  ;;  %212 = vmatpush3.xpose.msra.mxu1 %v16_v33 }
  0x42   :  { %178 = vmatmul.mubr.f32.vlgmr.msra.gmra.mxu0 %v257_v7  ;;  %180 = vmatmul.mubr.f32.vlgmr.msra.gmra.mxu1 %v265_v9 }
 0x102   :  { %v126_v41 = vpop.f32.mrf.mxu0  ;;  %v132_v42 = vpop.f32.mrf.mxu1 }
 0x103   :  { %v127_v43 = vadd.f32 %v126_v41, %v53_v39  ;;  %v133_v44 = vadd.f32 %v132_v42, %v53_v39 }
 0x104   :  { %v128_v45 = vpop.f32.mrf.mxu0  ;;  %v134_v46 = vpop.f32.mrf.mxu1 }
 0x105   :  { %137 = vst [vmem:[%s361_s3] sm:$0xff] %v127_v43  ;;  %139 = vst [vmem:[%s361_s3 + $0x10] sm:$0xff] %v133_v44  ;;  %v129_v47 = vadd.f32 %v128_v45, %v57_v40  ;;  %v135_v48 = vadd.f32 %v134_v46, %v57_v40 }
 0x107   :  { %138 = vst [vmem:[%s361_s3 + $0x8] sm:$0xff] %v129_v47  ;;  %140 = vst [vmem:[%s361_s3 + $0x18] sm:$0xff] %v135_v48 }

</bundles_post_ra>
